<compile_context>
chip_gen: v7x
topology: tpu7x:2x2x1
jax: 0.10.0
libtpu: 0.0.40
codegen_flags: <defaults>
</compile_context>

<pallas_src>
import functools

import jax
import jax.numpy as jnp
from jax import lax
from jax.experimental import pallas as pl
from jax.experimental.pallas import tpu as pltpu


GROUP = 16  # in-kernel static unroll / scale-refold period; Tc is a multiple.


# --------------------------------------------------------------------------- #
# Pallas kernel: one (batch row, time chunk) of the FA-RNN recurrence.
# --------------------------------------------------------------------------- #
def _farnn_chunk_kernel(
    m_ref,       # (Tc, S, S) bf16  per-step transition matrices M_t
    start_ref,   # (1, S)     f32   automaton start state
    h_out_ref,   # (Tc, S)    bf16  normalized hidden trajectory (output block)
    h_chunk,     # (Tc, S)    f32   VMEM staging buffer for the chunk
    state_ref,   # (1, S)     f32   carried normalized state across time chunks
):
    chunk = pl.program_id(1)

    @pl.when(chunk == 0)
    def _init():  # new batch row -> reset the automaton state
        state_ref[...] = start_ref[...]

    tc = m_ref.shape[0]

    def group(g, a):
        # `a` enters the group as the normalized state.  Inside the group we
        # carry the unnormalized state and a running scale c, so the XLU max
        # and f32 divide hang off the matmul chain (they only feed the stored
        # output and the scale, never the next MXU op).
        base = pl.multiple_of(g * GROUP, GROUP)
        c = jnp.ones((1, 1), jnp.float32)
        for k in range(GROUP):                                  # static unroll
            a = jnp.dot(a.astype(jnp.bfloat16), m_ref[base + k],
                        preferred_element_type=jnp.float32)      # (1, S) f32
            amax = jnp.max(jnp.abs(a), axis=-1, keepdims=True)   # (1, 1) XLU
            c = c / jnp.maximum(c * amax, 1.0)                   # exact, f32
            h_chunk[pl.ds(base + k, 1), :] = a * c               # staged (VMEM)
        # Refold the scale into the carried state (keeps the unnormalized f32
        # carry bounded); the returned value is again the normalized state.
        return a * c

    a_final = lax.fori_loop(0, tc // GROUP, group, state_ref[...])
    state_ref[...] = a_final
    # Single bulk store of the whole chunk; bf16 halves HBM writeback bytes
    # (the downstream score GEMM casts H to bf16 anyway).
    h_out_ref[...] = h_chunk[...].astype(h_out_ref.dtype)


def farnn_recurrence(M_btss, start_vector, *, time_chunk=128):
    """M_btss: (B, T, S, S) f32 per-step transition matrices.

    Returns the normalized hidden trajectory H of shape (B, T, S) in bf16.
    """
    B, T, S, _ = M_btss.shape

    Tc = min(time_chunk, T)
    Tc = -(-Tc // GROUP) * GROUP            # multiple of the in-kernel group
    n_chunks = -(-T // Tc)
    T_pad = n_chunks * Tc
    if T_pad != T:
        # Padded steps get M = 0 -> their outputs are zeros at the tail of the
        # last chunk of each batch row and are sliced off below.
        M_btss = jnp.pad(M_btss, ((0, 0), (0, T_pad - T), (0, 0), (0, 0)))
    M_btss = M_btss.astype(jnp.bfloat16)

    start = start_vector.reshape(1, S).astype(jnp.float32)

    h = pl.pallas_call(
        _farnn_chunk_kernel,
        out_shape=jax.ShapeDtypeStruct((B, T_pad, S), jnp.bfloat16),
        grid=(B, n_chunks),
        in_specs=[
            pl.BlockSpec((None, Tc, S, S), lambda b, c: (b, c, 0, 0)),  # M
            pl.BlockSpec((1, S), lambda b, c: (0, 0)),                  # start
        ],
        out_specs=pl.BlockSpec((None, Tc, S), lambda b, c: (b, c, 0)),
        scratch_shapes=[
            pltpu.VMEM((Tc, S), jnp.float32),   # h_chunk staging buffer
            pltpu.VMEM((1, S), jnp.float32),    # carried automaton state
        ],
        compiler_params=pltpu.CompilerParams(
            # batch rows are independent (sharded across TCs on v7x); the time
            # chunk axis carries state and must stay sequential.
            dimension_semantics=("parallel", "arbitrary")),
    )(M_btss, start)
    return h[:, :T]


# --------------------------------------------------------------------------- #
# FARNN_S_bert forward (hoisted GEMMs in plain JAX, serial recurrence in Pallas).
# --------------------------------------------------------------------------- #
def farnn_s_bert_forward(params, input_ids, bert_input, bert_attend_mask,
                         bert_valid_mask, lengths, label, train=True,
                         re_tags=None, time_chunk=128):
    f32, bf16 = jnp.float32, jnp.bfloat16

    S, R = params["S1"].shape
    L = params["C_output_mat"].shape[1]
    B, T = input_ids.shape

    # ---- EmbedAggregator.forward_bert collapsed with the V projection ------ #
    #   u[b,t] = (static_embed[ids] + bert_vec @ W_bert) @ V
    #          = take(static_embed @ V, ids) + bert_vec @ (W_bert @ V)
    # TODO(synk): full BERT subword encoder + valid-mask subword->word gather is
    # replaced by precomputed word-aligned BERT features.
    EV = params["static_embed"] @ params["V"]                          # (vocab, R)
    WV = params["W_bert"] @ params["V"]                                # (bert_dim, R)
    emb_r = jnp.take(EV, input_ids, axis=0)                            # (B, T, R)
    bert_vec = bert_input * (bert_attend_mask * bert_valid_mask)[..., None]
    bert_r = jnp.einsum("bth,hr->btr", bert_vec.astype(bf16), WV.astype(bf16),
                        preferred_element_type=f32)                    # (B, T, R)
    U = emb_r + bert_r                                                 # (B, T, R)

    # ---- per-step transition matrices (fully parallel over B*T) ------------ #
    #   M[b,t] = S1 @ diag(u[b,t]) @ S2 + wildcard_mat
    # so the serial recurrence is a single matmul per step: h <- norm(h @ M_t).
    # NOTE: for very large B on single-TC chips the batched two-dot form can be
    # preferable; at small B this is strictly better and 2x on v7x.
    S1u = params["S1"][None, None, :, :] * U[:, :, None, :]            # (B, T, S, R)
    M = jnp.einsum("btsr,rz->btsz", S1u.astype(bf16),
                   params["S2"].astype(bf16),
                   preferred_element_type=f32)                         # (B, T, S, S)
    M = M + params["wildcard_mat"][None, None]

    # ---- FARNN_S_SF recurrence (Pallas hot path) ---------------------------- #
    H = farnn_recurrence(M, params["start_vector"],
                         time_chunk=time_chunk)                        # (B, T, S) bf16

    # ---- deferred output projection (one big lane-friendly GEMM) ------------ #
    scores = jnp.einsum("bts,sl->btl", H, params["C_output_mat"].astype(bf16),
                        preferred_element_type=f32)                    # (B, T, L)
    scores = scores + params["wildcard_output_vector"][None, None, :]
    # TODO(synk): final_vector / priority_mat based acceptance re-weighting of
    # the original FARNN_S_SF is not reproduced (exact usage not shown).

    # ---- masked token-level cross-entropy + flattened labels ---------------- #
    mask = (jnp.arange(T)[None, :] < lengths[:, None]).astype(f32)
    logp = jax.nn.log_softmax(scores, axis=-1)
    nll = -jnp.take_along_axis(logp, label[..., None], axis=-1)[..., 0]
    loss = jnp.sum(nll * mask) / jnp.maximum(jnp.sum(mask), 1.0)

    preds = jnp.argmax(scores, axis=-1)
    valid = mask > 0
    # NOTE: PyTorch returns dynamically-sized flattened tensors of only the
    # valid positions; JAX requires static shapes, so padding positions are -1.
    flattened_pred_labels = jnp.where(valid, preds, -1).reshape(-1)
    flattened_true_labels = jnp.where(valid, label, -1).reshape(-1)
    return loss, flattened_pred_labels, flattened_true_labels


# --------------------------------------------------------------------------- #
# Deterministic parameter construction (synthetic; shapes from __init__ args).
# --------------------------------------------------------------------------- #
def make_params(vocab, D, bert_dim, R, S, L, key):
    ks = jax.random.split(key, 10)
    scale = 0.1
    return {
        "static_embed": scale * jax.random.normal(ks[0], (vocab, D), jnp.float32),
        "W_bert":       scale * jax.random.normal(ks[1], (bert_dim, D), jnp.float32),
        "V":            scale * jax.random.normal(ks[2], (D, R), jnp.float32),
        "S1":           scale * jax.random.normal(ks[3], (S, R), jnp.float32),
        "S2":           scale * jax.random.normal(ks[4], (R, S), jnp.float32),
        "wildcard_mat": scale * jax.random.normal(ks[5], (S, S), jnp.float32),
        "C_output_mat": scale * jax.random.normal(ks[6], (S, L), jnp.float32),
        "wildcard_output_vector": scale * jax.random.normal(ks[7], (L,), jnp.float32),
        "final_vector": scale * jax.random.normal(ks[8], (S,), jnp.float32),
        "start_vector": jnp.zeros((S,), jnp.float32).at[0].set(1.0),
        "priority_mat": jnp.eye(L, dtype=jnp.float32),
    }


if __name__ == "__main__":
    B, T = 2, 8
    D = 32        # embedding dim
    BERT_DIM = 32
    R = 16        # decomposition rank
    S = 24        # automaton states
    L = 5         # slot labels
    VOCAB = 50

    key = jax.random.PRNGKey(0)
    k_in, k_bert, k_lab, k_param = jax.random.split(key, 4)

    input_ids = jax.random.randint(k_in, (B, T), 0, VOCAB, dtype=jnp.int32)
    bert_input = jax.random.normal(k_bert, (B, T, BERT_DIM), jnp.float32)
    bert_attend_mask = jnp.ones((B, T), jnp.float32)
    bert_valid_mask = jnp.ones((B, T), jnp.float32)
    lengths = jnp.array([T, T - 3], dtype=jnp.int32)
    label = jax.random.randint(k_lab, (B, T), 0, L, dtype=jnp.int32)

    params = make_params(VOCAB, D, BERT_DIM, R, S, L, k_param)

    fwd = jax.jit(functools.partial(farnn_s_bert_forward, params))
    loss, pred_labels, true_labels = fwd(
        input_ids, bert_input, bert_attend_mask, bert_valid_mask, lengths, label)
    jax.block_until_ready((loss, pred_labels, true_labels))
    assert loss.shape == ()
    assert pred_labels.shape == (B * T,)
    assert true_labels.shape == (B * T,)
    print("KERNEL_OK")
</pallas_src>

<mosaic_0001>
module attributes {stable_mosaic.version = 11 : i64} {
  func.func @_farnn_chunk_kernel(%arg0: i32, %arg1: i32, %arg2: memref<1x16x24x24xbf16, #tpu.memory_space<vmem>>, %arg3: memref<1x24xf32, #tpu.memory_space<vmem>>, %arg4: memref<1x16x24xbf16, #tpu.memory_space<vmem>>, %arg5: memref<16x24xf32, #tpu.memory_space<vmem>>, %arg6: memref<1x24xf32, #tpu.memory_space<vmem>>) attributes {dimension_semantics = [#tpu.dimension_semantics<parallel>, #tpu.dimension_semantics<arbitrary>], iteration_bounds = array<i64: 2, 1>, scalar_prefetch = 0 : i64, scratch_operands = 2 : i64, tpu.core_type = #tpu.core_type<tc>, window_params = [{transform_indices = @transform_0, window_bounds = array<i64: 1, 16, 24, 24>}, {pipeline_mode = #tpu.pipeline_mode<synchronous>, transform_indices = @transform_1, window_bounds = array<i64: 1, 24>}, {transform_indices = @transform_2, window_bounds = array<i64: 1, 16, 24>}]} {
    %c0_i32 = arith.constant 0 : i32
    %0 = arith.cmpi eq, %arg1, %c0_i32 : i32
    %1 = arith.extui %0 : i1 to i32
    %c0_i32_0 = arith.constant 0 : i32
    %2 = arith.cmpi ne, %1, %c0_i32_0 : i32
    scf.if %2 {
      %c0_140 = arith.constant 0 : index
      %c0_141 = arith.constant 0 : index
      %303 = vector.load %arg3[%c0_140, %c0_141] : memref<1x24xf32, #tpu.memory_space<vmem>>, vector<1x24xf32>
      %c0_142 = arith.constant 0 : index
      %c0_143 = arith.constant 0 : index
      %304 = vector.load %arg6[%c0_142, %c0_143] : memref<1x24xf32, #tpu.memory_space<vmem>>, vector<1x24xf32>
      tpu.vector_store %arg6[%c0_142, %c0_143], %303 {strides = array<i32>} : memref<1x24xf32, #tpu.memory_space<vmem>>, vector<1x24xf32>,
    } else {
    }
    %c0 = arith.constant 0 : index
    %c0_1 = arith.constant 0 : index
    %3 = vector.load %arg6[%c0, %c0_1] : memref<1x24xf32, #tpu.memory_space<vmem>>, vector<1x24xf32>
    %c0_i32_2 = arith.constant 0 : i32
    %c16_i32 = arith.constant 16 : i32
    %4 = arith.muli %c0_i32_2, %c16_i32 : i32
    %5 = tpu.assume_multiple %4, 16 : i32
    %cst = arith.constant 1.000000e+00 : f32
    %6 = vector.broadcast %cst : f32 to vector<1x1xf32>
    %7 = arith.truncf %3 : vector<1x24xf32> to vector<1x24xbf16>
    %c0_i32_3 = arith.constant 0 : i32
    %8 = arith.addi %5, %c0_i32_3 : i32
    %c0_4 = arith.constant 0 : index
    %9 = arith.index_cast %8 : i32 to index
    %c0_5 = arith.constant 0 : index
    %c0_6 = arith.constant 0 : index
    %10 = vector.load %arg2[%c0_4, %9, %c0_5, %c0_6] : memref<1x16x24x24xbf16, #tpu.memory_space<vmem>>, vector<1x1x24x24xbf16>
    %11 = vector.shape_cast %10 : vector<1x1x24x24xbf16> to vector<24x24xbf16>
    %cst_7 = arith.constant dense<0.000000e+00> : vector<1x24xf32>
    %12 = tpu.matmul %7, %11, %cst_7 {dimension_numbers = #tpu.dot_dimension_numbers<[1], [0], [0], [1], [0, 0, 1, 1], [], []>} : vector<1x24xbf16>, vector<24x24xbf16>, vector<1x24xf32> -> vector<1x24xf32>
    %13 = math.absf %12 : vector<1x24xf32>
    %cst_8 = arith.constant dense<0xFF800000> : vector<1xf32>
    %14 = vector.multi_reduction <maximumf>, %13, %cst_8 [1] : vector<1x24xf32> to vector<1xf32>
    %15 = vector.shape_cast %14 : vector<1xf32> to vector<1x1xf32>
    %16 = arith.mulf %6, %15 : vector<1x1xf32>
    %cst_9 = arith.constant 1.000000e+00 : f32
    %17 = vector.broadcast %cst_9 : f32 to vector<1x1xf32>
    %18 = arith.maximumf %16, %17 : vector<1x1xf32>
    %19 = arith.divf %6, %18 : vector<1x1xf32>
    %20 = vector.broadcast %19 : vector<1x1xf32> to vector<1x24xf32>
    %21 = arith.mulf %12, %20 : vector<1x24xf32>
    %c0_i32_10 = arith.constant 0 : i32
    %22 = arith.addi %5, %c0_i32_10 : i32
    %23 = arith.index_cast %22 : i32 to index
    %c0_11 = arith.constant 0 : index
    %24 = vector.load %arg5[%23, %c0_11] : memref<16x24xf32, #tpu.memory_space<vmem>>, vector<1x24xf32>
    tpu.vector_store %arg5[%23, %c0_11], %21 {strides = array<i32>} : memref<16x24xf32, #tpu.memory_space<vmem>>, vector<1x24xf32>,
    %25 = arith.truncf %12 : vector<1x24xf32> to vector<1x24xbf16>
    %c1_i32 = arith.constant 1 : i32
    %26 = arith.addi %5, %c1_i32 : i32
    %c0_12 = arith.constant 0 : index
    %27 = arith.index_cast %26 : i32 to index
    %c0_13 = arith.constant 0 : index
    %c0_14 = arith.constant 0 : index
    %28 = vector.load %arg2[%c0_12, %27, %c0_13, %c0_14] : memref<1x16x24x24xbf16, #tpu.memory_space<vmem>>, vector<1x1x24x24xbf16>
    %29 = vector.shape_cast %28 : vector<1x1x24x24xbf16> to vector<24x24xbf16>
    %cst_15 = arith.constant dense<0.000000e+00> : vector<1x24xf32>
    %30 = tpu.matmul %25, %29, %cst_15 {dimension_numbers = #tpu.dot_dimension_numbers<[1], [0], [0], [1], [0, 0, 1, 1], [], []>} : vector<1x24xbf16>, vector<24x24xbf16>, vector<1x24xf32> -> vector<1x24xf32>
    %31 = math.absf %30 : vector<1x24xf32>
    %cst_16 = arith.constant dense<0xFF800000> : vector<1xf32>
    %32 = vector.multi_reduction <maximumf>, %31, %cst_16 [1] : vector<1x24xf32> to vector<1xf32>
    %33 = vector.shape_cast %32 : vector<1xf32> to vector<1x1xf32>
    %34 = arith.mulf %19, %33 : vector<1x1xf32>
    %cst_17 = arith.constant 1.000000e+00 : f32
    %35 = vector.broadcast %cst_17 : f32 to vector<1x1xf32>
    %36 = arith.maximumf %34, %35 : vector<1x1xf32>
    %37 = arith.divf %19, %36 : vector<1x1xf32>
    %38 = vector.broadcast %37 : vector<1x1xf32> to vector<1x24xf32>
    %39 = arith.mulf %30, %38 : vector<1x24xf32>
    %c1_i32_18 = arith.constant 1 : i32
    %40 = arith.addi %5, %c1_i32_18 : i32
    %41 = arith.index_cast %40 : i32 to index
    %c0_19 = arith.constant 0 : index
    %42 = vector.load %arg5[%41, %c0_19] : memref<16x24xf32, #tpu.memory_space<vmem>>, vector<1x24xf32>
    tpu.vector_store %arg5[%41, %c0_19], %39 {strides = array<i32>} : memref<16x24xf32, #tpu.memory_space<vmem>>, vector<1x24xf32>,
    %43 = arith.truncf %30 : vector<1x24xf32> to vector<1x24xbf16>
    %c2_i32 = arith.constant 2 : i32
    %44 = arith.addi %5, %c2_i32 : i32
    %c0_20 = arith.constant 0 : index
    %45 = arith.index_cast %44 : i32 to index
    %c0_21 = arith.constant 0 : index
    %c0_22 = arith.constant 0 : index
    %46 = vector.load %arg2[%c0_20, %45, %c0_21, %c0_22] : memref<1x16x24x24xbf16, #tpu.memory_space<vmem>>, vector<1x1x24x24xbf16>
    %47 = vector.shape_cast %46 : vector<1x1x24x24xbf16> to vector<24x24xbf16>
    %cst_23 = arith.constant dense<0.000000e+00> : vector<1x24xf32>
    %48 = tpu.matmul %43, %47, %cst_23 {dimension_numbers = #tpu.dot_dimension_numbers<[1], [0], [0], [1], [0, 0, 1, 1], [], []>} : vector<1x24xbf16>, vector<24x24xbf16>, vector<1x24xf32> -> vector<1x24xf32>
    %49 = math.absf %48 : vector<1x24xf32>
    %cst_24 = arith.constant dense<0xFF800000> : vector<1xf32>
    %50 = vector.multi_reduction <maximumf>, %49, %cst_24 [1] : vector<1x24xf32> to vector<1xf32>
    %51 = vector.shape_cast %50 : vector<1xf32> to vector<1x1xf32>
    %52 = arith.mulf %37, %51 : vector<1x1xf32>
    %cst_25 = arith.constant 1.000000e+00 : f32
    %53 = vector.broadcast %cst_25 : f32 to vector<1x1xf32>
    %54 = arith.maximumf %52, %53 : vector<1x1xf32>
    %55 = arith.divf %37, %54 : vector<1x1xf32>
    %56 = vector.broadcast %55 : vector<1x1xf32> to vector<1x24xf32>
    %57 = arith.mulf %48, %56 : vector<1x24xf32>
    %c2_i32_26 = arith.constant 2 : i32
    %58 = arith.addi %5, %c2_i32_26 : i32
    %59 = arith.index_cast %58 : i32 to index
    %c0_27 = arith.constant 0 : index
    %60 = vector.load %arg5[%59, %c0_27] : memref<16x24xf32, #tpu.memory_space<vmem>>, vector<1x24xf32>
    tpu.vector_store %arg5[%59, %c0_27], %57 {strides = array<i32>} : memref<16x24xf32, #tpu.memory_space<vmem>>, vector<1x24xf32>,
    %61 = arith.truncf %48 : vector<1x24xf32> to vector<1x24xbf16>
    %c3_i32 = arith.constant 3 : i32
    %62 = arith.addi %5, %c3_i32 : i32
    %c0_28 = arith.constant 0 : index
    %63 = arith.index_cast %62 : i32 to index
    %c0_29 = arith.constant 0 : index
    %c0_30 = arith.constant 0 : index
    %64 = vector.load %arg2[%c0_28, %63, %c0_29, %c0_30] : memref<1x16x24x24xbf16, #tpu.memory_space<vmem>>, vector<1x1x24x24xbf16>
    %65 = vector.shape_cast %64 : vector<1x1x24x24xbf16> to vector<24x24xbf16>
    %cst_31 = arith.constant dense<0.000000e+00> : vector<1x24xf32>
    %66 = tpu.matmul %61, %65, %cst_31 {dimension_numbers = #tpu.dot_dimension_numbers<[1], [0], [0], [1], [0, 0, 1, 1], [], []>} : vector<1x24xbf16>, vector<24x24xbf16>, vector<1x24xf32> -> vector<1x24xf32>
    %67 = math.absf %66 : vector<1x24xf32>
    %cst_32 = arith.constant dense<0xFF800000> : vector<1xf32>
    %68 = vector.multi_reduction <maximumf>, %67, %cst_32 [1] : vector<1x24xf32> to vector<1xf32>
    %69 = vector.shape_cast %68 : vector<1xf32> to vector<1x1xf32>
    %70 = arith.mulf %55, %69 : vector<1x1xf32>
    %cst_33 = arith.constant 1.000000e+00 : f32
    %71 = vector.broadcast %cst_33 : f32 to vector<1x1xf32>
    %72 = arith.maximumf %70, %71 : vector<1x1xf32>
    %73 = arith.divf %55, %72 : vector<1x1xf32>
    %74 = vector.broadcast %73 : vector<1x1xf32> to vector<1x24xf32>
    %75 = arith.mulf %66, %74 : vector<1x24xf32>
    %c3_i32_34 = arith.constant 3 : i32
    %76 = arith.addi %5, %c3_i32_34 : i32
    %77 = arith.index_cast %76 : i32 to index
    %c0_35 = arith.constant 0 : index
    %78 = vector.load %arg5[%77, %c0_35] : memref<16x24xf32, #tpu.memory_space<vmem>>, vector<1x24xf32>
    tpu.vector_store %arg5[%77, %c0_35], %75 {strides = array<i32>} : memref<16x24xf32, #tpu.memory_space<vmem>>, vector<1x24xf32>,
    %79 = arith.truncf %66 : vector<1x24xf32> to vector<1x24xbf16>
    %c4_i32 = arith.constant 4 : i32
    %80 = arith.addi %5, %c4_i32 : i32
    %c0_36 = arith.constant 0 : index
    %81 = arith.index_cast %80 : i32 to index
    %c0_37 = arith.constant 0 : index
    %c0_38 = arith.constant 0 : index
    %82 = vector.load %arg2[%c0_36, %81, %c0_37, %c0_38] : memref<1x16x24x24xbf16, #tpu.memory_space<vmem>>, vector<1x1x24x24xbf16>
    %83 = vector.shape_cast %82 : vector<1x1x24x24xbf16> to vector<24x24xbf16>
    %cst_39 = arith.constant dense<0.000000e+00> : vector<1x24xf32>
    %84 = tpu.matmul %79, %83, %cst_39 {dimension_numbers = #tpu.dot_dimension_numbers<[1], [0], [0], [1], [0, 0, 1, 1], [], []>} : vector<1x24xbf16>, vector<24x24xbf16>, vector<1x24xf32> -> vector<1x24xf32>
    %85 = math.absf %84 : vector<1x24xf32>
    %cst_40 = arith.constant dense<0xFF800000> : vector<1xf32>
    %86 = vector.multi_reduction <maximumf>, %85, %cst_40 [1] : vector<1x24xf32> to vector<1xf32>
    %87 = vector.shape_cast %86 : vector<1xf32> to vector<1x1xf32>
    %88 = arith.mulf %73, %87 : vector<1x1xf32>
    %cst_41 = arith.constant 1.000000e+00 : f32
    %89 = vector.broadcast %cst_41 : f32 to vector<1x1xf32>
    %90 = arith.maximumf %88, %89 : vector<1x1xf32>
    %91 = arith.divf %73, %90 : vector<1x1xf32>
    %92 = vector.broadcast %91 : vector<1x1xf32> to vector<1x24xf32>
    %93 = arith.mulf %84, %92 : vector<1x24xf32>
    %c4_i32_42 = arith.constant 4 : i32
    %94 = arith.addi %5, %c4_i32_42 : i32
    %95 = arith.index_cast %94 : i32 to index
    %c0_43 = arith.constant 0 : index
    %96 = vector.load %arg5[%95, %c0_43] : memref<16x24xf32, #tpu.memory_space<vmem>>, vector<1x24xf32>
    tpu.vector_store %arg5[%95, %c0_43], %93 {strides = array<i32>} : memref<16x24xf32, #tpu.memory_space<vmem>>, vector<1x24xf32>,
    %97 = arith.truncf %84 : vector<1x24xf32> to vector<1x24xbf16>
    %c5_i32 = arith.constant 5 : i32
    %98 = arith.addi %5, %c5_i32 : i32
    %c0_44 = arith.constant 0 : index
    %99 = arith.index_cast %98 : i32 to index
    %c0_45 = arith.constant 0 : index
    %c0_46 = arith.constant 0 : index
    %100 = vector.load %arg2[%c0_44, %99, %c0_45, %c0_46] : memref<1x16x24x24xbf16, #tpu.memory_space<vmem>>, vector<1x1x24x24xbf16>
    %101 = vector.shape_cast %100 : vector<1x1x24x24xbf16> to vector<24x24xbf16>
    %cst_47 = arith.constant dense<0.000000e+00> : vector<1x24xf32>
    %102 = tpu.matmul %97, %101, %cst_47 {dimension_numbers = #tpu.dot_dimension_numbers<[1], [0], [0], [1], [0, 0, 1, 1], [], []>} : vector<1x24xbf16>, vector<24x24xbf16>, vector<1x24xf32> -> vector<1x24xf32>
    %103 = math.absf %102 : vector<1x24xf32>
    %cst_48 = arith.constant dense<0xFF800000> : vector<1xf32>
    %104 = vector.multi_reduction <maximumf>, %103, %cst_48 [1] : vector<1x24xf32> to vector<1xf32>
    %105 = vector.shape_cast %104 : vector<1xf32> to vector<1x1xf32>
    %106 = arith.mulf %91, %105 : vector<1x1xf32>
    %cst_49 = arith.constant 1.000000e+00 : f32
    %107 = vector.broadcast %cst_49 : f32 to vector<1x1xf32>
    %108 = arith.maximumf %106, %107 : vector<1x1xf32>
    %109 = arith.divf %91, %108 : vector<1x1xf32>
    %110 = vector.broadcast %109 : vector<1x1xf32> to vector<1x24xf32>
    %111 = arith.mulf %102, %110 : vector<1x24xf32>
    %c5_i32_50 = arith.constant 5 : i32
    %112 = arith.addi %5, %c5_i32_50 : i32
    %113 = arith.index_cast %112 : i32 to index
    %c0_51 = arith.constant 0 : index
    %114 = vector.load %arg5[%113, %c0_51] : memref<16x24xf32, #tpu.memory_space<vmem>>, vector<1x24xf32>
    tpu.vector_store %arg5[%113, %c0_51], %111 {strides = array<i32>} : memref<16x24xf32, #tpu.memory_space<vmem>>, vector<1x24xf32>,
    %115 = arith.truncf %102 : vector<1x24xf32> to vector<1x24xbf16>
    %c6_i32 = arith.constant 6 : i32
    %116 = arith.addi %5, %c6_i32 : i32
    %c0_52 = arith.constant 0 : index
    %117 = arith.index_cast %116 : i32 to index
    %c0_53 = arith.constant 0 : index
    %c0_54 = arith.constant 0 : index
    %118 = vector.load %arg2[%c0_52, %117, %c0_53, %c0_54] : memref<1x16x24x24xbf16, #tpu.memory_space<vmem>>, vector<1x1x24x24xbf16>
    %119 = vector.shape_cast %118 : vector<1x1x24x24xbf16> to vector<24x24xbf16>
    %cst_55 = arith.constant dense<0.000000e+00> : vector<1x24xf32>
    %120 = tpu.matmul %115, %119, %cst_55 {dimension_numbers = #tpu.dot_dimension_numbers<[1], [0], [0], [1], [0, 0, 1, 1], [], []>} : vector<1x24xbf16>, vector<24x24xbf16>, vector<1x24xf32> -> vector<1x24xf32>
    %121 = math.absf %120 : vector<1x24xf32>
    %cst_56 = arith.constant dense<0xFF800000> : vector<1xf32>
    %122 = vector.multi_reduction <maximumf>, %121, %cst_56 [1] : vector<1x24xf32> to vector<1xf32>
    %123 = vector.shape_cast %122 : vector<1xf32> to vector<1x1xf32>
    %124 = arith.mulf %109, %123 : vector<1x1xf32>
    %cst_57 = arith.constant 1.000000e+00 : f32
    %125 = vector.broadcast %cst_57 : f32 to vector<1x1xf32>
    %126 = arith.maximumf %124, %125 : vector<1x1xf32>
    %127 = arith.divf %109, %126 : vector<1x1xf32>
    %128 = vector.broadcast %127 : vector<1x1xf32> to vector<1x24xf32>
    %129 = arith.mulf %120, %128 : vector<1x24xf32>
    %c6_i32_58 = arith.constant 6 : i32
    %130 = arith.addi %5, %c6_i32_58 : i32
    %131 = arith.index_cast %130 : i32 to index
    %c0_59 = arith.constant 0 : index
    %132 = vector.load %arg5[%131, %c0_59] : memref<16x24xf32, #tpu.memory_space<vmem>>, vector<1x24xf32>
    tpu.vector_store %arg5[%131, %c0_59], %129 {strides = array<i32>} : memref<16x24xf32, #tpu.memory_space<vmem>>, vector<1x24xf32>,
    %133 = arith.truncf %120 : vector<1x24xf32> to vector<1x24xbf16>
    %c7_i32 = arith.constant 7 : i32
    %134 = arith.addi %5, %c7_i32 : i32
    %c0_60 = arith.constant 0 : index
    %135 = arith.index_cast %134 : i32 to index
    %c0_61 = arith.constant 0 : index
    %c0_62 = arith.constant 0 : index
    %136 = vector.load %arg2[%c0_60, %135, %c0_61, %c0_62] : memref<1x16x24x24xbf16, #tpu.memory_space<vmem>>, vector<1x1x24x24xbf16>
    %137 = vector.shape_cast %136 : vector<1x1x24x24xbf16> to vector<24x24xbf16>
    %cst_63 = arith.constant dense<0.000000e+00> : vector<1x24xf32>
    %138 = tpu.matmul %133, %137, %cst_63 {dimension_numbers = #tpu.dot_dimension_numbers<[1], [0], [0], [1], [0, 0, 1, 1], [], []>} : vector<1x24xbf16>, vector<24x24xbf16>, vector<1x24xf32> -> vector<1x24xf32>
    %139 = math.absf %138 : vector<1x24xf32>
    %cst_64 = arith.constant dense<0xFF800000> : vector<1xf32>
    %140 = vector.multi_reduction <maximumf>, %139, %cst_64 [1] : vector<1x24xf32> to vector<1xf32>
    %141 = vector.shape_cast %140 : vector<1xf32> to vector<1x1xf32>
    %142 = arith.mulf %127, %141 : vector<1x1xf32>
    %cst_65 = arith.constant 1.000000e+00 : f32
    %143 = vector.broadcast %cst_65 : f32 to vector<1x1xf32>
    %144 = arith.maximumf %142, %143 : vector<1x1xf32>
    %145 = arith.divf %127, %144 : vector<1x1xf32>
    %146 = vector.broadcast %145 : vector<1x1xf32> to vector<1x24xf32>
    %147 = arith.mulf %138, %146 : vector<1x24xf32>
    %c7_i32_66 = arith.constant 7 : i32
    %148 = arith.addi %5, %c7_i32_66 : i32
    %149 = arith.index_cast %148 : i32 to index
    %c0_67 = arith.constant 0 : index
    %150 = vector.load %arg5[%149, %c0_67] : memref<16x24xf32, #tpu.memory_space<vmem>>, vector<1x24xf32>
    tpu.vector_store %arg5[%149, %c0_67], %147 {strides = array<i32>} : memref<16x24xf32, #tpu.memory_space<vmem>>, vector<1x24xf32>,
    %151 = arith.truncf %138 : vector<1x24xf32> to vector<1x24xbf16>
    %c8_i32 = arith.constant 8 : i32
    %152 = arith.addi %5, %c8_i32 : i32
    %c0_68 = arith.constant 0 : index
    %153 = arith.index_cast %152 : i32 to index
    %c0_69 = arith.constant 0 : index
    %c0_70 = arith.constant 0 : index
    %154 = vector.load %arg2[%c0_68, %153, %c0_69, %c0_70] : memref<1x16x24x24xbf16, #tpu.memory_space<vmem>>, vector<1x1x24x24xbf16>
    %155 = vector.shape_cast %154 : vector<1x1x24x24xbf16> to vector<24x24xbf16>
    %cst_71 = arith.constant dense<0.000000e+00> : vector<1x24xf32>
    %156 = tpu.matmul %151, %155, %cst_71 {dimension_numbers = #tpu.dot_dimension_numbers<[1], [0], [0], [1], [0, 0, 1, 1], [], []>} : vector<1x24xbf16>, vector<24x24xbf16>, vector<1x24xf32> -> vector<1x24xf32>
    %157 = math.absf %156 : vector<1x24xf32>
    %cst_72 = arith.constant dense<0xFF800000> : vector<1xf32>
    %158 = vector.multi_reduction <maximumf>, %157, %cst_72 [1] : vector<1x24xf32> to vector<1xf32>
    %159 = vector.shape_cast %158 : vector<1xf32> to vector<1x1xf32>
    %160 = arith.mulf %145, %159 : vector<1x1xf32>
    %cst_73 = arith.constant 1.000000e+00 : f32
    %161 = vector.broadcast %cst_73 : f32 to vector<1x1xf32>
    %162 = arith.maximumf %160, %161 : vector<1x1xf32>
    %163 = arith.divf %145, %162 : vector<1x1xf32>
    %164 = vector.broadcast %163 : vector<1x1xf32> to vector<1x24xf32>
    %165 = arith.mulf %156, %164 : vector<1x24xf32>
    %c8_i32_74 = arith.constant 8 : i32
    %166 = arith.addi %5, %c8_i32_74 : i32
    %167 = arith.index_cast %166 : i32 to index
    %c0_75 = arith.constant 0 : index
    %168 = vector.load %arg5[%167, %c0_75] : memref<16x24xf32, #tpu.memory_space<vmem>>, vector<1x24xf32>
    tpu.vector_store %arg5[%167, %c0_75], %165 {strides = array<i32>} : memref<16x24xf32, #tpu.memory_space<vmem>>, vector<1x24xf32>,
    %169 = arith.truncf %156 : vector<1x24xf32> to vector<1x24xbf16>
    %c9_i32 = arith.constant 9 : i32
    %170 = arith.addi %5, %c9_i32 : i32
    %c0_76 = arith.constant 0 : index
    %171 = arith.index_cast %170 : i32 to index
    %c0_77 = arith.constant 0 : index
    %c0_78 = arith.constant 0 : index
    %172 = vector.load %arg2[%c0_76, %171, %c0_77, %c0_78] : memref<1x16x24x24xbf16, #tpu.memory_space<vmem>>, vector<1x1x24x24xbf16>
    %173 = vector.shape_cast %172 : vector<1x1x24x24xbf16> to vector<24x24xbf16>
    %cst_79 = arith.constant dense<0.000000e+00> : vector<1x24xf32>
    %174 = tpu.matmul %169, %173, %cst_79 {dimension_numbers = #tpu.dot_dimension_numbers<[1], [0], [0], [1], [0, 0, 1, 1], [], []>} : vector<1x24xbf16>, vector<24x24xbf16>, vector<1x24xf32> -> vector<1x24xf32>
    %175 = math.absf %174 : vector<1x24xf32>
    %cst_80 = arith.constant dense<0xFF800000> : vector<1xf32>
    %176 = vector.multi_reduction <maximumf>, %175, %cst_80 [1] : vector<1x24xf32> to vector<1xf32>
    %177 = vector.shape_cast %176 : vector<1xf32> to vector<1x1xf32>
    %178 = arith.mulf %163, %177 : vector<1x1xf32>
    %cst_81 = arith.constant 1.000000e+00 : f32
    %179 = vector.broadcast %cst_81 : f32 to vector<1x1xf32>
    %180 = arith.maximumf %178, %179 : vector<1x1xf32>
    %181 = arith.divf %163, %180 : vector<1x1xf32>
    %182 = vector.broadcast %181 : vector<1x1xf32> to vector<1x24xf32>
    %183 = arith.mulf %174, %182 : vector<1x24xf32>
    %c9_i32_82 = arith.constant 9 : i32
    %184 = arith.addi %5, %c9_i32_82 : i32
    %185 = arith.index_cast %184 : i32 to index
    %c0_83 = arith.constant 0 : index
    %186 = vector.load %arg5[%185, %c0_83] : memref<16x24xf32, #tpu.memory_space<vmem>>, vector<1x24xf32>
    tpu.vector_store %arg5[%185, %c0_83], %183 {strides = array<i32>} : memref<16x24xf32, #tpu.memory_space<vmem>>, vector<1x24xf32>,
    %187 = arith.truncf %174 : vector<1x24xf32> to vector<1x24xbf16>
    %c10_i32 = arith.constant 10 : i32
    %188 = arith.addi %5, %c10_i32 : i32
    %c0_84 = arith.constant 0 : index
    %189 = arith.index_cast %188 : i32 to index
    %c0_85 = arith.constant 0 : index
    %c0_86 = arith.constant 0 : index
    %190 = vector.load %arg2[%c0_84, %189, %c0_85, %c0_86] : memref<1x16x24x24xbf16, #tpu.memory_space<vmem>>, vector<1x1x24x24xbf16>
    %191 = vector.shape_cast %190 : vector<1x1x24x24xbf16> to vector<24x24xbf16>
    %cst_87 = arith.constant dense<0.000000e+00> : vector<1x24xf32>
    %192 = tpu.matmul %187, %191, %cst_87 {dimension_numbers = #tpu.dot_dimension_numbers<[1], [0], [0], [1], [0, 0, 1, 1], [], []>} : vector<1x24xbf16>, vector<24x24xbf16>, vector<1x24xf32> -> vector<1x24xf32>
    %193 = math.absf %192 : vector<1x24xf32>
    %cst_88 = arith.constant dense<0xFF800000> : vector<1xf32>
    %194 = vector.multi_reduction <maximumf>, %193, %cst_88 [1] : vector<1x24xf32> to vector<1xf32>
    %195 = vector.shape_cast %194 : vector<1xf32> to vector<1x1xf32>
    %196 = arith.mulf %181, %195 : vector<1x1xf32>
    %cst_89 = arith.constant 1.000000e+00 : f32
    %197 = vector.broadcast %cst_89 : f32 to vector<1x1xf32>
    %198 = arith.maximumf %196, %197 : vector<1x1xf32>
    %199 = arith.divf %181, %198 : vector<1x1xf32>
    %200 = vector.broadcast %199 : vector<1x1xf32> to vector<1x24xf32>
    %201 = arith.mulf %192, %200 : vector<1x24xf32>
    %c10_i32_90 = arith.constant 10 : i32
    %202 = arith.addi %5, %c10_i32_90 : i32
    %203 = arith.index_cast %202 : i32 to index
    %c0_91 = arith.constant 0 : index
    %204 = vector.load %arg5[%203, %c0_91] : memref<16x24xf32, #tpu.memory_space<vmem>>, vector<1x24xf32>
    tpu.vector_store %arg5[%203, %c0_91], %201 {strides = array<i32>} : memref<16x24xf32, #tpu.memory_space<vmem>>, vector<1x24xf32>,
    %205 = arith.truncf %192 : vector<1x24xf32> to vector<1x24xbf16>
    %c11_i32 = arith.constant 11 : i32
    %206 = arith.addi %5, %c11_i32 : i32
    %c0_92 = arith.constant 0 : index
    %207 = arith.index_cast %206 : i32 to index
    %c0_93 = arith.constant 0 : index
    %c0_94 = arith.constant 0 : index
    %208 = vector.load %arg2[%c0_92, %207, %c0_93, %c0_94] : memref<1x16x24x24xbf16, #tpu.memory_space<vmem>>, vector<1x1x24x24xbf16>
    %209 = vector.shape_cast %208 : vector<1x1x24x24xbf16> to vector<24x24xbf16>
    %cst_95 = arith.constant dense<0.000000e+00> : vector<1x24xf32>
    %210 = tpu.matmul %205, %209, %cst_95 {dimension_numbers = #tpu.dot_dimension_numbers<[1], [0], [0], [1], [0, 0, 1, 1], [], []>} : vector<1x24xbf16>, vector<24x24xbf16>, vector<1x24xf32> -> vector<1x24xf32>
    %211 = math.absf %210 : vector<1x24xf32>
    %cst_96 = arith.constant dense<0xFF800000> : vector<1xf32>
    %212 = vector.multi_reduction <maximumf>, %211, %cst_96 [1] : vector<1x24xf32> to vector<1xf32>
    %213 = vector.shape_cast %212 : vector<1xf32> to vector<1x1xf32>
    %214 = arith.mulf %199, %213 : vector<1x1xf32>
    %cst_97 = arith.constant 1.000000e+00 : f32
    %215 = vector.broadcast %cst_97 : f32 to vector<1x1xf32>
    %216 = arith.maximumf %214, %215 : vector<1x1xf32>
    %217 = arith.divf %199, %216 : vector<1x1xf32>
    %218 = vector.broadcast %217 : vector<1x1xf32> to vector<1x24xf32>
    %219 = arith.mulf %210, %218 : vector<1x24xf32>
    %c11_i32_98 = arith.constant 11 : i32
    %220 = arith.addi %5, %c11_i32_98 : i32
    %221 = arith.index_cast %220 : i32 to index
    %c0_99 = arith.constant 0 : index
    %222 = vector.load %arg5[%221, %c0_99] : memref<16x24xf32, #tpu.memory_space<vmem>>, vector<1x24xf32>
    tpu.vector_store %arg5[%221, %c0_99], %219 {strides = array<i32>} : memref<16x24xf32, #tpu.memory_space<vmem>>, vector<1x24xf32>,
    %223 = arith.truncf %210 : vector<1x24xf32> to vector<1x24xbf16>
    %c12_i32 = arith.constant 12 : i32
    %224 = arith.addi %5, %c12_i32 : i32
    %c0_100 = arith.constant 0 : index
    %225 = arith.index_cast %224 : i32 to index
    %c0_101 = arith.constant 0 : index
    %c0_102 = arith.constant 0 : index
    %226 = vector.load %arg2[%c0_100, %225, %c0_101, %c0_102] : memref<1x16x24x24xbf16, #tpu.memory_space<vmem>>, vector<1x1x24x24xbf16>
    %227 = vector.shape_cast %226 : vector<1x1x24x24xbf16> to vector<24x24xbf16>
    %cst_103 = arith.constant dense<0.000000e+00> : vector<1x24xf32>
    %228 = tpu.matmul %223, %227, %cst_103 {dimension_numbers = #tpu.dot_dimension_numbers<[1], [0], [0], [1], [0, 0, 1, 1], [], []>} : vector<1x24xbf16>, vector<24x24xbf16>, vector<1x24xf32> -> vector<1x24xf32>
    %229 = math.absf %228 : vector<1x24xf32>
    %cst_104 = arith.constant dense<0xFF800000> : vector<1xf32>
    %230 = vector.multi_reduction <maximumf>, %229, %cst_104 [1] : vector<1x24xf32> to vector<1xf32>
    %231 = vector.shape_cast %230 : vector<1xf32> to vector<1x1xf32>
    %232 = arith.mulf %217, %231 : vector<1x1xf32>
    %cst_105 = arith.constant 1.000000e+00 : f32
    %233 = vector.broadcast %cst_105 : f32 to vector<1x1xf32>
    %234 = arith.maximumf %232, %233 : vector<1x1xf32>
    %235 = arith.divf %217, %234 : vector<1x1xf32>
    %236 = vector.broadcast %235 : vector<1x1xf32> to vector<1x24xf32>
    %237 = arith.mulf %228, %236 : vector<1x24xf32>
    %c12_i32_106 = arith.constant 12 : i32
    %238 = arith.addi %5, %c12_i32_106 : i32
    %239 = arith.index_cast %238 : i32 to index
    %c0_107 = arith.constant 0 : index
    %240 = vector.load %arg5[%239, %c0_107] : memref<16x24xf32, #tpu.memory_space<vmem>>, vector<1x24xf32>
    tpu.vector_store %arg5[%239, %c0_107], %237 {strides = array<i32>} : memref<16x24xf32, #tpu.memory_space<vmem>>, vector<1x24xf32>,
    %241 = arith.truncf %228 : vector<1x24xf32> to vector<1x24xbf16>
    %c13_i32 = arith.constant 13 : i32
    %242 = arith.addi %5, %c13_i32 : i32
    %c0_108 = arith.constant 0 : index
    %243 = arith.index_cast %242 : i32 to index
    %c0_109 = arith.constant 0 : index
    %c0_110 = arith.constant 0 : index
    %244 = vector.load %arg2[%c0_108, %243, %c0_109, %c0_110] : memref<1x16x24x24xbf16, #tpu.memory_space<vmem>>, vector<1x1x24x24xbf16>
    %245 = vector.shape_cast %244 : vector<1x1x24x24xbf16> to vector<24x24xbf16>
    %cst_111 = arith.constant dense<0.000000e+00> : vector<1x24xf32>
    %246 = tpu.matmul %241, %245, %cst_111 {dimension_numbers = #tpu.dot_dimension_numbers<[1], [0], [0], [1], [0, 0, 1, 1], [], []>} : vector<1x24xbf16>, vector<24x24xbf16>, vector<1x24xf32> -> vector<1x24xf32>
    %247 = math.absf %246 : vector<1x24xf32>
    %cst_112 = arith.constant dense<0xFF800000> : vector<1xf32>
    %248 = vector.multi_reduction <maximumf>, %247, %cst_112 [1] : vector<1x24xf32> to vector<1xf32>
    %249 = vector.shape_cast %248 : vector<1xf32> to vector<1x1xf32>
    %250 = arith.mulf %235, %249 : vector<1x1xf32>
    %cst_113 = arith.constant 1.000000e+00 : f32
    %251 = vector.broadcast %cst_113 : f32 to vector<1x1xf32>
    %252 = arith.maximumf %250, %251 : vector<1x1xf32>
    %253 = arith.divf %235, %252 : vector<1x1xf32>
    %254 = vector.broadcast %253 : vector<1x1xf32> to vector<1x24xf32>
    %255 = arith.mulf %246, %254 : vector<1x24xf32>
    %c13_i32_114 = arith.constant 13 : i32
    %256 = arith.addi %5, %c13_i32_114 : i32
    %257 = arith.index_cast %256 : i32 to index
    %c0_115 = arith.constant 0 : index
    %258 = vector.load %arg5[%257, %c0_115] : memref<16x24xf32, #tpu.memory_space<vmem>>, vector<1x24xf32>
    tpu.vector_store %arg5[%257, %c0_115], %255 {strides = array<i32>} : memref<16x24xf32, #tpu.memory_space<vmem>>, vector<1x24xf32>,
    %259 = arith.truncf %246 : vector<1x24xf32> to vector<1x24xbf16>
    %c14_i32 = arith.constant 14 : i32
    %260 = arith.addi %5, %c14_i32 : i32
    %c0_116 = arith.constant 0 : index
    %261 = arith.index_cast %260 : i32 to index
    %c0_117 = arith.constant 0 : index
    %c0_118 = arith.constant 0 : index
    %262 = vector.load %arg2[%c0_116, %261, %c0_117, %c0_118] : memref<1x16x24x24xbf16, #tpu.memory_space<vmem>>, vector<1x1x24x24xbf16>
    %263 = vector.shape_cast %262 : vector<1x1x24x24xbf16> to vector<24x24xbf16>
    %cst_119 = arith.constant dense<0.000000e+00> : vector<1x24xf32>
    %264 = tpu.matmul %259, %263, %cst_119 {dimension_numbers = #tpu.dot_dimension_numbers<[1], [0], [0], [1], [0, 0, 1, 1], [], []>} : vector<1x24xbf16>, vector<24x24xbf16>, vector<1x24xf32> -> vector<1x24xf32>
    %265 = math.absf %264 : vector<1x24xf32>
    %cst_120 = arith.constant dense<0xFF800000> : vector<1xf32>
    %266 = vector.multi_reduction <maximumf>, %265, %cst_120 [1] : vector<1x24xf32> to vector<1xf32>
    %267 = vector.shape_cast %266 : vector<1xf32> to vector<1x1xf32>
    %268 = arith.mulf %253, %267 : vector<1x1xf32>
    %cst_121 = arith.constant 1.000000e+00 : f32
    %269 = vector.broadcast %cst_121 : f32 to vector<1x1xf32>
    %270 = arith.maximumf %268, %269 : vector<1x1xf32>
    %271 = arith.divf %253, %270 : vector<1x1xf32>
    %272 = vector.broadcast %271 : vector<1x1xf32> to vector<1x24xf32>
    %273 = arith.mulf %264, %272 : vector<1x24xf32>
    %c14_i32_122 = arith.constant 14 : i32
    %274 = arith.addi %5, %c14_i32_122 : i32
    %275 = arith.index_cast %274 : i32 to index
    %c0_123 = arith.constant 0 : index
    %276 = vector.load %arg5[%275, %c0_123] : memref<16x24xf32, #tpu.memory_space<vmem>>, vector<1x24xf32>
    tpu.vector_store %arg5[%275, %c0_123], %273 {strides = array<i32>} : memref<16x24xf32, #tpu.memory_space<vmem>>, vector<1x24xf32>,
    %277 = arith.truncf %264 : vector<1x24xf32> to vector<1x24xbf16>
    %c15_i32 = arith.constant 15 : i32
    %278 = arith.addi %5, %c15_i32 : i32
    %c0_124 = arith.constant 0 : index
    %279 = arith.index_cast %278 : i32 to index
    %c0_125 = arith.constant 0 : index
    %c0_126 = arith.constant 0 : index
    %280 = vector.load %arg2[%c0_124, %279, %c0_125, %c0_126] : memref<1x16x24x24xbf16, #tpu.memory_space<vmem>>, vector<1x1x24x24xbf16>
    %281 = vector.shape_cast %280 : vector<1x1x24x24xbf16> to vector<24x24xbf16>
    %cst_127 = arith.constant dense<0.000000e+00> : vector<1x24xf32>
    %282 = tpu.matmul %277, %281, %cst_127 {dimension_numbers = #tpu.dot_dimension_numbers<[1], [0], [0], [1], [0, 0, 1, 1], [], []>} : vector<1x24xbf16>, vector<24x24xbf16>, vector<1x24xf32> -> vector<1x24xf32>
    %283 = math.absf %282 : vector<1x24xf32>
    %cst_128 = arith.constant dense<0xFF800000> : vector<1xf32>
    %284 = vector.multi_reduction <maximumf>, %283, %cst_128 [1] : vector<1x24xf32> to vector<1xf32>
    %285 = vector.shape_cast %284 : vector<1xf32> to vector<1x1xf32>
    %286 = arith.mulf %271, %285 : vector<1x1xf32>
    %cst_129 = arith.constant 1.000000e+00 : f32
    %287 = vector.broadcast %cst_129 : f32 to vector<1x1xf32>
    %288 = arith.maximumf %286, %287 : vector<1x1xf32>
    %289 = arith.divf %271, %288 : vector<1x1xf32>
    %290 = vector.broadcast %289 : vector<1x1xf32> to vector<1x24xf32>
    %291 = arith.mulf %282, %290 : vector<1x24xf32>
    %c15_i32_130 = arith.constant 15 : i32
    %292 = arith.addi %5, %c15_i32_130 : i32
    %293 = arith.index_cast %292 : i32 to index
    %c0_131 = arith.constant 0 : index
    %294 = vector.load %arg5[%293, %c0_131] : memref<16x24xf32, #tpu.memory_space<vmem>>, vector<1x24xf32>
    tpu.vector_store %arg5[%293, %c0_131], %291 {strides = array<i32>} : memref<16x24xf32, #tpu.memory_space<vmem>>, vector<1x24xf32>,
    %295 = vector.broadcast %289 : vector<1x1xf32> to vector<1x24xf32>
    %296 = arith.mulf %282, %295 : vector<1x24xf32>
    %c1_i32_132 = arith.constant 1 : i32
    %c0_133 = arith.constant 0 : index
    %c0_134 = arith.constant 0 : index
    %297 = vector.load %arg6[%c0_133, %c0_134] : memref<1x24xf32, #tpu.memory_space<vmem>>, vector<1x24xf32>
    tpu.vector_store %arg6[%c0_133, %c0_134], %296 {strides = array<i32>} : memref<1x24xf32, #tpu.memory_space<vmem>>, vector<1x24xf32>,
    %c0_135 = arith.constant 0 : index
    %c0_136 = arith.constant 0 : index
    %298 = vector.load %arg5[%c0_135, %c0_136] : memref<16x24xf32, #tpu.memory_space<vmem>>, vector<16x24xf32>
    %299 = arith.truncf %298 : vector<16x24xf32> to vector<16x24xbf16>
    %c0_137 = arith.constant 0 : index
    %c0_138 = arith.constant 0 : index
    %c0_139 = arith.constant 0 : index
    %300 = vector.load %arg4[%c0_137, %c0_138, %c0_139] : memref<1x16x24xbf16, #tpu.memory_space<vmem>>, vector<1x16x24xbf16>
    %301 = vector.shape_cast %300 : vector<1x16x24xbf16> to vector<16x24xbf16>
    %302 = vector.shape_cast %299 : vector<16x24xbf16> to vector<1x16x24xbf16>
    tpu.vector_store %arg4[%c0_137, %c0_138, %c0_139], %302 {strides = array<i32>} : memref<1x16x24xbf16, #tpu.memory_space<vmem>>, vector<1x16x24xbf16>,
    return
  }
  func.func @transform_0(%arg0: i32, %arg1: i32) -> (i32, i32, i32, i32) {
    %c0_i32 = arith.constant 0 : i32
    %c0_i32_0 = arith.constant 0 : i32
    %c0_i32_1 = arith.constant 0 : i32
    return %arg0, %arg1, %c0_i32, %c0_i32_0 : i32, i32, i32, i32
  }
  func.func @transform_1(%arg0: i32, %arg1: i32) -> (i32, i32) {
    %c0_i32 = arith.constant 0 : i32
    %c0_i32_0 = arith.constant 0 : i32
    %c0_i32_1 = arith.constant 0 : i32
    return %c0_i32, %c0_i32_0 : i32, i32
  }
  func.func @transform_2(%arg0: i32, %arg1: i32) -> (i32, i32, i32) {
    %c0_i32 = arith.constant 0 : i32
    %c0_i32_0 = arith.constant 0 : i32
    return %arg0, %arg1, %c0_i32 : i32, i32, i32
  }
}

</mosaic_0001>

<bundles_post_ra>
// kernel: mul.13
= control target key start
LH: loop header
LB: loop body
LE: loop exit
PB: predicated region body
PF: predicated region fallthrough
CT: control target
= control target key end

     0   :  { %s34_s0 = inlined_call_operand.vmem [shape: f32[2,8], index: 0, kind: input, shape index: {}]   ;;  %s35_s1 = inlined_call_operand.vmem [shape: f32[2,8], index: 1, kind: input, shape index: {}]   ;;  %s36_s2 = inlined_call_operand.vmem [shape: f32[2,8], index: 2, kind: output, shape index: {}]  }
   0x1   :  { %v3_v0 = vld [vmem:[%s34_s0] sm:$0x3] }
   0x2   :  { %v4_v1 = vld [vmem:[%s35_s1] sm:$0x3] }
   0x3   :  { %v7_v2 = vmul.f32 %v4_v1, %v3_v0 }
   0x5   :  { %9 = vst [vmem:[%s36_s2] sm:$0x3] %v7_v2 }

// kernel: farnn_s_bert_forward.1
= control target key start
LH: loop header
LB: loop body
LE: loop exit
PB: predicated region body
PF: predicated region fallthrough
CT: control target
= control target key end

     0   :  { %s1929_s9 = smov 0   ;;  %s1931_s10 = smov 0   ;;  %s2139_s0 = inlined_call_operand.vmem [shape: bf16[2,16,24,24], index: 0, kind: input, shape index: {}]   ;;  %s2140_s1 = inlined_call_operand.vmem [shape: f32[1,24], index: 1, kind: input, shape index: {}]   ;;  %s2141_s2 = inlined_call_operand.vmem [shape: bf16[2,16,24], index: 2, kind: output, shape index: {}]  }
   0x1   :  { %s1933_s11 = smov 0  }
   0x2 LB: > { %s24_s12 = sadd.s32 1, %s1906_s10  ;;  %p1517_p0 = scmp.ge.s32.totalorder %s1910_s11, 1  ;;  %s1910_s11 = sphi %s1933_s11, %s12_s11   ;;  %s1906_s10 = sphi %s1931_s10, %s2143_s10   ;;  %s1902_s9 = sphi %s1929_s9, %s2142_s9  }
   0x3   : > { %p26_p1 = scmp.ge.s32.totalorder %s24_s12, 2  ;;  %p134_p2 = scmp.lt.s32.totalorder %s1910_s11, 3 }
   0x5   : > { %s2145_s12 = smov (%p26_p1, %s24_s12), 0  ;;  %p135_p3 = pnand %p1517_p0, %p134_p2 }
   0x6   : > { %p166_p4 = scmp.lt.s32.totalorder (!%p135_p3), %s1902_s9, 1  ;;  %v191_v0 = vld [vmem:[%s2140_s1] sm:$0x1] (!%p135_p3)  ;;  %v1912_v1 = vmov (!%p135_p3), 0.0   ;;  %vm1913_vm0 = vmmov (!%p135_p3), 0   ;;  %vm192_vm1 = vcmask (!%p135_p3), 188416  }
   0x7   : > { %138 = sbr.rel (%p135_p3) target bundleno = 3623 (0xe27), region = 28  ;;  %1669 = vmatprep.subr.bf16.mxu0 (!%p135_p3), %v1912_v1  ;;  %1673 = vmatprep.mubr.msk.bf16.mxu0 (!%p135_p3), %vm1913_vm0, %v1912_v1  ;;  %193 = vst.msk [vmem:[#allocation3] sm:$0x1] (!%p135_p3), %vm192_vm1, %v191_v0  ;;  %vm215_vm2 = vcmask (!%p135_p3), 1043456   ;;  %vm211_vm3 = vcmask (!%p135_p3), 195584   ;;  %vm1390_vm4 = vcmask (!%p135_p3), 191488  }
   0x8   : > { %1677 = vmatprep.subr.bf16.mxu1 (!%p135_p3), %v1912_v1  ;;  %1681 = vmatprep.mubr.msk.bf16.mxu1 (!%p135_p3), %vm1913_vm0, %v1912_v1 }
   0xe   : > { %s2147_s9 = smov (!%p166_p4, %s1902_s9), 1  ;;  %v194_v4 = vld [vmem:[#allocation3] sm:$0x1] }
   0xf   : > { %s1797_s15 = smul.u32 192, %s2147_s9  ;;  %v195_v7 = vpack.c.bf16 %v194_v4, %v194_v4  ;;  %s1618_s19 = sshll.u32 %s2147_s9, 3 }
  0x10   : > { %s2062_s22 = scalar_lea.vmem %s2141_s2, %s1618_s19 }
  0x11   : > { %s1963_s18 = scalar_lea.vmem %s2139_s0, %s1797_s15 }
  0x12   : > { %v1824_v2 = vld [vmem:[%s1963_s18] sm:$0xff]   ;;  %v1825_v3 = vld [vmem:[%s1963_s18 + $0x8] ss:$0 sps:$4 sm:$0xff]   ;;  %v1826_v5 = vld [vmem:[%s1963_s18 + $0xc] sm:$0xff]  }
  0x13   : > { %1670 = vmatpush3.bf16.msra.mxu0 %v1824_v2  ;;  %v217_v6 = vsel %vm215_vm2, %v1825_v3, 0  ;;  %1678 = vmatpush3.bf16.msra.mxu1 %v1826_v5  ;;  %v1827_v8 = vld [vmem:[%s1963_s18 + $0x14] ss:$0 sps:$4 sm:$0xff]   ;;  %v1828_v17 = vld [vmem:[%s1963_s18 + $0x18] sm:$0xff]   ;;  %v1829_v18 = vld [vmem:[%s1963_s18 + $0x20] ss:$0 sps:$4 sm:$0xff]  }
  0x14   : > { %1671 = vmatprep.subr.bf16.mxu0 %v1912_v1  ;;  %1679 = vmatprep.subr.bf16.mxu1 %v1912_v1  ;;  %v290_v9 = vsel %vm215_vm2, %v1827_v8, 0  ;;  %v364_v19 = vsel %vm215_vm2, %v1829_v18, 0  ;;  %v1830_v31 = vld [vmem:[%s1963_s18 + $0x24] sm:$0xff]   ;;  %v1831_v32 = vld [vmem:[%s1963_s18 + $0x2c] ss:$0 sps:$4 sm:$0xff]   ;;  %v1832_v47 = vld [vmem:[%s1963_s18 + $0x30] sm:$0xff]  }
  0x15   : > { %v438_v33 = vsel %vm215_vm2, %v1831_v32, 0  ;;  %v1833_v48 = vld [vmem:[%s1963_s18 + $0x38] ss:$0 sps:$4 sm:$0xff]   ;;  %v1834_v63 = vld [vmem:[%s1963_s18 + $0x3c] sm:$0xff]   ;;  %v1835_v0 = vld [vmem:[%s1963_s18 + $0x44] ss:$0 sps:$4 sm:$0xff]  }
  0x16   : > { %v512_v49 = vsel %vm215_vm2, %v1833_v48, 0  ;;  %v586_v2 = vsel %vm215_vm2, %v1835_v0, 0  ;;  %v1838_v32 = vld [vmem:[%s1963_s18 + $0x54] sm:$0xff]   ;;  %v1840_v48 = vld [vmem:[%s1963_s18 + $0x60] sm:$0xff]   ;;  %v1842_v0 = vld [vmem:[%s1963_s18 + $0x6c] sm:$0xff]  }
  0x17   : > { %1672 = vmatpush3.bf16.msra.mxu0 %v217_v6  ;;  %1680 = vmatpush3.bf16.msra.mxu1 %v290_v9 }
  0x18   : > { %1685 = vmatprep.subr.bf16.mxu0 %v1912_v1  ;;  %1693 = vmatprep.subr.bf16.mxu1 %v1912_v1 }
  0x1a   : > { %1674 = vmatmul.mubr.msk.bf16.vlgmr.msra.gmra.mrb[0].mxu0 %vm211_vm3, %v195_v7 }
  0x1b   : > { %1689 = vmatprep.mubr.msk.bf16.mxu0 %vm1913_vm0, %v1912_v1  ;;  %1686 = vmatpush3.bf16.msra.mxu0 %v1828_v17  ;;  %v1837_v17 = vld [vmem:[%s1963_s18 + $0x50] ss:$0 sps:$4 sm:$0xff]  }
  0x1c   : > { %1687 = vmatprep.subr.bf16.mxu0 %v1912_v1  ;;  %v660_v18 = vsel %vm215_vm2, %v1837_v17, 0 }
  0x1f   : > { %1688 = vmatpush3.bf16.msra.mxu0 %v364_v19 }
  0x20   : > { %1701 = vmatprep.subr.bf16.mxu0 %v1912_v1 }
  0xed   : > { %v253_v10 = vpop.f32.mrb[0].mxu0 }
  0xee   : > { %v269_v11 = vpack.c.bf16 %v253_v10, %v253_v10  ;;  %v1675_v12 = vpop.f32.mrb[1].mxu0  ;;  %v259_v13 = vand.u32 2147483647, %v253_v10 }
  0xef   : > { %v256_v14 = vpop.f32.mrb[2].mxu0 }
  0xf0   : > { %v1676_v15 = vpop.f32.mrb[3].mxu0  ;;  %1682 = vmatmul.mubr.msk.bf16.vlgmr.msra.gmra.mrb[0].mxu1 %vm211_vm3, %v269_v11  ;;  %v261_v16 = vsel %vm192_vm1, %v259_v13, -inf }
  0xf1   : > { %262 = vmax.xlane.f32.xlu0 %v261_v16  ;;  %1697 = vmatprep.mubr.msk.bf16.mxu1 %vm1913_vm0, %v1912_v1  ;;  %v1836_v16 = vld [vmem:[%s1963_s18 + $0x48] sm:$0xff]  }
  0xf2   : > { %1694 = vmatpush3.bf16.msra.mxu1 %v1830_v31 }
  0xf3   : > { %1695 = vmatprep.subr.bf16.mxu1 %v1912_v1 }
  0xf6   : > { %1696 = vmatpush3.bf16.msra.mxu1 %v438_v33  ;;  %v1839_v33 = vld [vmem:[%s1963_s18 + $0x5c] ss:$0 sps:$4 sm:$0xff]  }
  0xf7   : > { %1709 = vmatprep.subr.bf16.mxu1 %v1912_v1 }
 0x17e   : > { %v263_v20 = vpop.xlane.xlu0 %262 }
 0x17f   : > { %v264_v21 = vmax.f32 %v263_v20, 1.0 }
 0x181   : > { %1856 = vrcp.f32 %v264_v21 }
 0x18b   : > { %v1857_v22 = vpop.eup %1856 }
 0x18c   : > { %v267_v23 = vmul.f32 %v1857_v22, %v253_v10 }
 0x18e   : > { %268 = vst.msk [vmem:[#allocation2] sm:$0x1] %vm192_vm1, %v267_v23 }
 0x1c3   : > { %v326_v24 = vpop.f32.mrb[0].mxu1 }
 0x1c4   : > { %v343_v25 = vpack.c.bf16 %v326_v24, %v326_v24  ;;  %v1683_v26 = vpop.f32.mrb[1].mxu1  ;;  %v332_v27 = vand.u32 2147483647, %v326_v24 }
 0x1c5   : > { %v329_v28 = vpop.f32.mrb[2].mxu1 }
 0x1c6   : > { %v1684_v29 = vpop.f32.mrb[3].mxu1  ;;  %1690 = vmatmul.mubr.msk.bf16.vlgmr.msra.gmra.mrb[4].mxu0 %vm211_vm3, %v343_v25  ;;  %v333_v30 = vsel %vm192_vm1, %v332_v27, -inf }
 0x1c7   : > { %334 = vmax.xlane.f32.xlu0 %v333_v30  ;;  %1705 = vmatprep.mubr.msk.bf16.mxu0 %vm1913_vm0, %v1912_v1 }
 0x1c8   : > { %1702 = vmatpush3.bf16.msra.mxu0 %v1832_v47 }
 0x1c9   : > { %1703 = vmatprep.subr.bf16.mxu0 %v1912_v1 }
 0x1cc   : > { %1704 = vmatpush3.bf16.msra.mxu0 %v512_v49  ;;  %v1841_v49 = vld [vmem:[%s1963_s18 + $0x68] ss:$0 sps:$4 sm:$0xff]  }
 0x1cd   : > { %1717 = vmatprep.subr.bf16.mxu0 %v1912_v1 }
 0x254   : > { %v335_v34 = vpop.xlane.xlu0 %334 }
 0x255   : > { %v336_v35 = vmul.f32 %v1857_v22, %v335_v34  ;;  %v734_v34 = vsel %vm215_vm2, %v1839_v33, 0 }
 0x257   : > { %v337_v36 = vmax.f32 %v336_v35, 1.0 }
 0x259   : > { %1858 = vrcp.f32 %v337_v36 }
 0x263   : > { %v1859_v37 = vpop.eup %1858 }
 0x264   : > { %v339_v38 = vmul.f32 %v1859_v37, %v1857_v22 }
 0x266   : > { %v340_v39 = vmul.f32 %v339_v38, %v326_v24 }
 0x268   : > { %342 = vst.msk [vmem:[#allocation2 + $0x1] sm:$0x1] %vm192_vm1, %v340_v39 }
 0x299   : > { %v400_v40 = vpop.f32.mrb[4].mxu0 }
 0x29a   : > { %v417_v41 = vpack.c.bf16 %v400_v40, %v400_v40  ;;  %v1691_v42 = vpop.f32.mrb[5].mxu0  ;;  %v406_v43 = vand.u32 2147483647, %v400_v40 }
 0x29b   : > { %v403_v44 = vpop.f32.mrb[6].mxu0 }
 0x29c   : > { %v1692_v45 = vpop.f32.mrb[7].mxu0  ;;  %1698 = vmatmul.mubr.msk.bf16.vlgmr.msra.gmra.mrb[4].mxu1 %vm211_vm3, %v417_v41  ;;  %v407_v46 = vsel %vm192_vm1, %v406_v43, -inf }
 0x29d   : > { %408 = vmax.xlane.f32.xlu1 %v407_v46  ;;  %1713 = vmatprep.mubr.msk.bf16.mxu1 %vm1913_vm0, %v1912_v1 }
 0x29e   : > { %1710 = vmatpush3.bf16.msra.mxu1 %v1834_v63 }
 0x29f   : > { %1711 = vmatprep.subr.bf16.mxu1 %v1912_v1 }
 0x2a2   : > { %1712 = vmatpush3.bf16.msra.mxu1 %v586_v2  ;;  %v1843_v2 = vld [vmem:[%s1963_s18 + $0x74] ss:$0 sps:$4 sm:$0xff]  }
 0x2a3   : > { %1725 = vmatprep.subr.bf16.mxu1 %v1912_v1 }
 0x32a   : > { %v409_v50 = vpop.xlane.xlu1 %408 }
 0x32b   : > { %v410_v51 = vmul.f32 %v409_v50, %v339_v38  ;;  %v808_v50 = vsel %vm215_vm2, %v1841_v49, 0 }
 0x32d   : > { %v411_v52 = vmax.f32 %v410_v51, 1.0 }
 0x32f   : > { %1860 = vrcp.f32 %v411_v52 }
 0x339   : > { %v1861_v53 = vpop.eup %1860 }
 0x33a   : > { %v413_v54 = vmul.f32 %v1861_v53, %v339_v38 }
 0x33c   : > { %v414_v55 = vmul.f32 %v413_v54, %v400_v40 }
 0x33e   : > { %416 = vst.msk [vmem:[#allocation2 + $0x2] sm:$0x1] %vm192_vm1, %v414_v55 }
 0x36f   : > { %v474_v56 = vpop.f32.mrb[4].mxu1 }
 0x370   : > { %v491_v57 = vpack.c.bf16 %v474_v56, %v474_v56  ;;  %v1699_v58 = vpop.f32.mrb[5].mxu1  ;;  %v480_v59 = vand.u32 2147483647, %v474_v56 }
 0x371   : > { %v477_v60 = vpop.f32.mrb[6].mxu1 }
 0x372   : > { %v1700_v61 = vpop.f32.mrb[7].mxu1  ;;  %1706 = vmatmul.mubr.msk.bf16.vlgmr.msra.gmra.mrb[8].mxu0 %vm211_vm3, %v491_v57  ;;  %v481_v62 = vsel %vm192_vm1, %v480_v59, -inf }
 0x373   : > { %482 = vmax.xlane.f32.xlu1 %v481_v62  ;;  %1721 = vmatprep.mubr.msk.bf16.mxu0 %vm1913_vm0, %v1912_v1 }
 0x374   : > { %1718 = vmatpush3.bf16.msra.mxu0 %v1836_v16 }
 0x375   : > { %1719 = vmatprep.subr.bf16.mxu0 %v1912_v1 }
 0x378   : > { %1720 = vmatpush3.bf16.msra.mxu0 %v660_v18 }
 0x379   : > { %1733 = vmatprep.subr.bf16.mxu0 %v1912_v1 }
 0x400   : > { %v483_v3 = vpop.xlane.xlu1 %482 }
 0x401   : > { %v484_v4 = vmul.f32 %v483_v3, %v413_v54  ;;  %v882_v3 = vsel %vm215_vm2, %v1843_v2, 0 }
 0x403   : > { %v485_v5 = vmax.f32 %v484_v4, 1.0 }
 0x405   : > { %1862 = vrcp.f32 %v485_v5 }
 0x40f   : > { %v1863_v6 = vpop.eup %1862 }
 0x410   : > { %v487_v7 = vmul.f32 %v1863_v6, %v413_v54 }
 0x412   : > { %v488_v8 = vmul.f32 %v487_v7, %v474_v56 }
 0x414   : > { %490 = vst.msk [vmem:[#allocation2 + $0x3] sm:$0x1] %vm192_vm1, %v488_v8 }
 0x445   : > { %v548_v9 = vpop.f32.mrb[8].mxu0 }
 0x446   : > { %v565_v10 = vpack.c.bf16 %v548_v9, %v548_v9  ;;  %v1707_v11 = vpop.f32.mrb[9].mxu0  ;;  %v554_v12 = vand.u32 2147483647, %v548_v9 }
 0x447   : > { %v551_v13 = vpop.f32.mrb[10].mxu0 }
 0x448   : > { %v1708_v14 = vpop.f32.mrb[11].mxu0  ;;  %1714 = vmatmul.mubr.msk.bf16.vlgmr.msra.gmra.mrb[8].mxu1 %vm211_vm3, %v565_v10  ;;  %v555_v15 = vsel %vm192_vm1, %v554_v12, -inf }
 0x449   : > { %556 = vmax.xlane.f32.xlu0 %v555_v15  ;;  %1729 = vmatprep.mubr.msk.bf16.mxu1 %vm1913_vm0, %v1912_v1 }
 0x44a   : > { %1726 = vmatpush3.bf16.msra.mxu1 %v1838_v32 }
 0x44b   : > { %1727 = vmatprep.subr.bf16.mxu1 %v1912_v1 }
 0x44e   : > { %1728 = vmatpush3.bf16.msra.mxu1 %v734_v34 }
 0x44f   : > { %1741 = vmatprep.subr.bf16.mxu1 %v1912_v1 }
 0x4d6   : > { %v557_v19 = vpop.xlane.xlu0 %556 }
 0x4d7   : > { %v558_v20 = vmul.f32 %v557_v19, %v487_v7  ;;  %v1844_v19 = vld [vmem:[%s1963_s18 + $0x78] sm:$0xff]  }
 0x4d9   : > { %v559_v21 = vmax.f32 %v558_v20, 1.0  ;;  %v1845_v20 = vld [vmem:[%s1963_s18 + $0x80] ss:$0 sps:$4 sm:$0xff]  }
 0x4db   : > { %1864 = vrcp.f32 %v559_v21  ;;  %v956_v21 = vsel %vm215_vm2, %v1845_v20, 0  ;;  %v1852_v20 = vld [vmem:[%s1963_s18 + $0xa8] sm:$0xff]  }
 0x4e5   : > { %v1865_v22 = vpop.eup %1864 }
 0x4e6   : > { %v561_v23 = vmul.f32 %v1865_v22, %v487_v7 }
 0x4e8   : > { %v562_v24 = vmul.f32 %v561_v23, %v548_v9 }
 0x4ea   : > { %564 = vst.msk [vmem:[#allocation2 + $0x4] sm:$0x1] %vm192_vm1, %v562_v24 }
 0x51b   : > { %v622_v25 = vpop.f32.mrb[8].mxu1 }
 0x51c   : > { %v639_v26 = vpack.c.bf16 %v622_v25, %v622_v25  ;;  %v1715_v27 = vpop.f32.mrb[9].mxu1  ;;  %v628_v28 = vand.u32 2147483647, %v622_v25 }
 0x51d   : > { %v625_v29 = vpop.f32.mrb[10].mxu1 }
 0x51e   : > { %v1716_v30 = vpop.f32.mrb[11].mxu1  ;;  %1722 = vmatmul.mubr.msk.bf16.vlgmr.msra.gmra.mrb[12].mxu0 %vm211_vm3, %v639_v26  ;;  %v629_v31 = vsel %vm192_vm1, %v628_v28, -inf }
 0x51f   : > { %630 = vmax.xlane.f32.xlu1 %v629_v31  ;;  %1737 = vmatprep.mubr.msk.bf16.mxu0 %vm1913_vm0, %v1912_v1 }
 0x520   : > { %1734 = vmatpush3.bf16.msra.mxu0 %v1840_v48 }
 0x521   : > { %1735 = vmatprep.subr.bf16.mxu0 %v1912_v1 }
 0x524   : > { %1736 = vmatpush3.bf16.msra.mxu0 %v808_v50 }
 0x525   : > { %1749 = vmatprep.subr.bf16.mxu0 %v1912_v1 }
 0x5ac   : > { %v631_v35 = vpop.xlane.xlu1 %630 }
 0x5ad   : > { %v632_v36 = vmul.f32 %v631_v35, %v561_v23  ;;  %v1846_v35 = vld [vmem:[%s1963_s18 + $0x84] sm:$0xff]  }
 0x5af   : > { %v633_v37 = vmax.f32 %v632_v36, 1.0  ;;  %v1847_v36 = vld [vmem:[%s1963_s18 + $0x8c] ss:$0 sps:$4 sm:$0xff]  }
 0x5b1   : > { %1866 = vrcp.f32 %v633_v37  ;;  %v1030_v37 = vsel %vm215_vm2, %v1847_v36, 0  ;;  %v1854_v36 = vld [vmem:[%s1963_s18 + $0xb4] sm:$0xff]  }
 0x5bb   : > { %v1867_v38 = vpop.eup %1866 }
 0x5bc   : > { %v635_v39 = vmul.f32 %v1867_v38, %v561_v23 }
 0x5be   : > { %v636_v40 = vmul.f32 %v635_v39, %v622_v25 }
 0x5c0   : > { %638 = vst.msk [vmem:[#allocation2 + $0x5] sm:$0x1] %vm192_vm1, %v636_v40 }
 0x5f1   : > { %v696_v41 = vpop.f32.mrb[12].mxu0 }
 0x5f2   : > { %v713_v42 = vpack.c.bf16 %v696_v41, %v696_v41  ;;  %v1723_v43 = vpop.f32.mrb[13].mxu0  ;;  %v702_v44 = vand.u32 2147483647, %v696_v41 }
 0x5f3   : > { %v699_v45 = vpop.f32.mrb[14].mxu0 }
 0x5f4   : > { %v1724_v46 = vpop.f32.mrb[15].mxu0  ;;  %1730 = vmatmul.mubr.msk.bf16.vlgmr.msra.gmra.mrb[12].mxu1 %vm211_vm3, %v713_v42  ;;  %v703_v47 = vsel %vm192_vm1, %v702_v44, -inf }
 0x5f5   : > { %704 = vmax.xlane.f32.xlu0 %v703_v47  ;;  %1745 = vmatprep.mubr.msk.bf16.mxu1 %vm1913_vm0, %v1912_v1 }
 0x5f6   : > { %1742 = vmatpush3.bf16.msra.mxu1 %v1842_v0 }
 0x5f7   : > { %1743 = vmatprep.subr.bf16.mxu1 %v1912_v1 }
 0x5fa   : > { %1744 = vmatpush3.bf16.msra.mxu1 %v882_v3 }
 0x5fb   : > { %1757 = vmatprep.subr.bf16.mxu1 %v1912_v1 }
 0x682   : > { %v705_v51 = vpop.xlane.xlu0 %704 }
 0x683   : > { %v706_v52 = vmul.f32 %v705_v51, %v635_v39  ;;  %v1848_v51 = vld [vmem:[%s1963_s18 + $0x90] sm:$0xff]  }
 0x685   : > { %v707_v53 = vmax.f32 %v706_v52, 1.0  ;;  %v1849_v52 = vld [vmem:[%s1963_s18 + $0x98] ss:$0 sps:$4 sm:$0xff]  }
 0x687   : > { %1868 = vrcp.f32 %v707_v53  ;;  %v1104_v53 = vsel %vm215_vm2, %v1849_v52, 0 }
 0x691   : > { %v1869_v54 = vpop.eup %1868 }
 0x692   : > { %v709_v55 = vmul.f32 %v1869_v54, %v635_v39 }
 0x694   : > { %v710_v56 = vmul.f32 %v709_v55, %v696_v41 }
 0x696   : > { %712 = vst.msk [vmem:[#allocation2 + $0x6] sm:$0x1] %vm192_vm1, %v710_v56 }
 0x6c7   : > { %v770_v57 = vpop.f32.mrb[12].mxu1 }
 0x6c8   : > { %v787_v58 = vpack.c.bf16 %v770_v57, %v770_v57  ;;  %v1731_v59 = vpop.f32.mrb[13].mxu1  ;;  %v776_v60 = vand.u32 2147483647, %v770_v57 }
 0x6c9   : > { %v773_v61 = vpop.f32.mrb[14].mxu1 }
 0x6ca   : > { %v1732_v62 = vpop.f32.mrb[15].mxu1  ;;  %1738 = vmatmul.mubr.msk.bf16.vlgmr.msra.gmra.mrb[16].mxu0 %vm211_vm3, %v787_v58  ;;  %v777_v63 = vsel %vm192_vm1, %v776_v60, -inf }
 0x6cb   : > { %778 = vmax.xlane.f32.xlu1 %v777_v63  ;;  %1753 = vmatprep.mubr.msk.bf16.mxu0 %vm1913_vm0, %v1912_v1 }
 0x6cc   : > { %1750 = vmatpush3.bf16.msra.mxu0 %v1844_v19 }
 0x6cd   : > { %1751 = vmatprep.subr.bf16.mxu0 %v1912_v1 }
 0x6d0   : > { %1752 = vmatpush3.bf16.msra.mxu0 %v956_v21  ;;  %v1853_v21 = vld [vmem:[%s1963_s18 + $0xb0] ss:$0 sps:$4 sm:$0xff]  }
 0x6d1   : > { %1765 = vmatprep.subr.bf16.mxu0 %v1912_v1 }
 0x758   : > { %v779_v4 = vpop.xlane.xlu1 %778 }
 0x759   : > { %v780_v5 = vmul.f32 %v779_v4, %v709_v55  ;;  %v1850_v4 = vld [vmem:[%s1963_s18 + $0x9c] sm:$0xff]  }
 0x75b   : > { %v781_v6 = vmax.f32 %v780_v5, 1.0  ;;  %v1851_v5 = vld [vmem:[%s1963_s18 + $0xa4] ss:$0 sps:$4 sm:$0xff]  }
 0x75d   : > { %1870 = vrcp.f32 %v781_v6  ;;  %v1178_v6 = vsel %vm215_vm2, %v1851_v5, 0 }
 0x767   : > { %v1871_v7 = vpop.eup %1870 }
 0x768   : > { %v783_v8 = vmul.f32 %v1871_v7, %v709_v55 }
 0x76a   : > { %v784_v9 = vmul.f32 %v783_v8, %v770_v57 }
 0x76c   : > { %786 = vst.msk [vmem:[#allocation2 + $0x7] sm:$0x1] %vm192_vm1, %v784_v9 }
 0x773   : > { %v1380_v10 = vld [vmem:[#allocation2] sm:$0xff] }
 0x774   : > { %v1619_v11 = vpack.c.bf16 %v1380_v10, %v1380_v10 }
 0x776   : > { %1391 = vst.msk [vmem:[%s2062_s22] sm:$0xf] %vm1390_vm4, %v1619_v11 }
 0x79d   : > { %v844_v12 = vpop.f32.mrb[16].mxu0 }
 0x79e   : > { %v861_v13 = vpack.c.bf16 %v844_v12, %v844_v12  ;;  %v1739_v14 = vpop.f32.mrb[17].mxu0  ;;  %v850_v15 = vand.u32 2147483647, %v844_v12 }
 0x79f   : > { %v847_v16 = vpop.f32.mrb[18].mxu0 }
 0x7a0   : > { %v1740_v17 = vpop.f32.mrb[19].mxu0  ;;  %1746 = vmatmul.mubr.msk.bf16.vlgmr.msra.gmra.mrb[16].mxu1 %vm211_vm3, %v861_v13  ;;  %v851_v18 = vsel %vm192_vm1, %v850_v15, -inf }
 0x7a1   : > { %852 = vmax.xlane.f32.xlu0 %v851_v18  ;;  %1761 = vmatprep.mubr.msk.bf16.mxu1 %vm1913_vm0, %v1912_v1 }
 0x7a2   : > { %1758 = vmatpush3.bf16.msra.mxu1 %v1846_v35 }
 0x7a3   : > { %1759 = vmatprep.subr.bf16.mxu1 %v1912_v1 }
 0x7a6   : > { %1760 = vmatpush3.bf16.msra.mxu1 %v1030_v37  ;;  %v1855_v37 = vld [vmem:[%s1963_s18 + $0xbc] ss:$0 sps:$4 sm:$0xff]  }
 0x7a7   : > { %1773 = vmatprep.subr.bf16.mxu1 %v1912_v1 }
 0x82e   : > { %v853_v22 = vpop.xlane.xlu0 %852 }
 0x82f   : > { %v854_v23 = vmul.f32 %v853_v22, %v783_v8  ;;  %v1252_v22 = vsel %vm215_vm2, %v1853_v21, 0 }
 0x831   : > { %v855_v24 = vmax.f32 %v854_v23, 1.0 }
 0x833   : > { %1872 = vrcp.f32 %v855_v24 }
 0x83d   : > { %v1873_v25 = vpop.eup %1872 }
 0x83e   : > { %v857_v26 = vmul.f32 %v1873_v25, %v783_v8 }
 0x840   : > { %v858_v27 = vmul.f32 %v857_v26, %v844_v12 }
 0x842   : > { %860 = vst.msk [vmem:[#allocation2 + $0x8] sm:$0x1] %vm192_vm1, %v858_v27 }
 0x873   : > { %v918_v28 = vpop.f32.mrb[16].mxu1 }
 0x874   : > { %v935_v29 = vpack.c.bf16 %v918_v28, %v918_v28  ;;  %v1747_v30 = vpop.f32.mrb[17].mxu1  ;;  %v924_v31 = vand.u32 2147483647, %v918_v28 }
 0x875   : > { %v921_v32 = vpop.f32.mrb[18].mxu1 }
 0x876   : > { %v1748_v33 = vpop.f32.mrb[19].mxu1  ;;  %1754 = vmatmul.mubr.msk.bf16.vlgmr.msra.gmra.mrb[20].mxu0 %vm211_vm3, %v935_v29  ;;  %v925_v34 = vsel %vm192_vm1, %v924_v31, -inf }
 0x877   : > { %926 = vmax.xlane.f32.xlu1 %v925_v34  ;;  %1769 = vmatprep.mubr.msk.bf16.mxu0 %vm1913_vm0, %v1912_v1 }
 0x878   : > { %1766 = vmatpush3.bf16.msra.mxu0 %v1848_v51 }
 0x879   : > { %1767 = vmatprep.subr.bf16.mxu0 %v1912_v1 }
 0x87c   : > { %1768 = vmatpush3.bf16.msra.mxu0 %v1104_v53 }
 0x87d   : > { %1781 = vmatprep.subr.bf16.mxu0 %v1912_v1 }
 0x904   : > { %v927_v38 = vpop.xlane.xlu1 %926 }
 0x905   : > { %v928_v39 = vmul.f32 %v927_v38, %v857_v26  ;;  %v1326_v38 = vsel %vm215_vm2, %v1855_v37, 0 }
 0x907   : > { %v929_v40 = vmax.f32 %v928_v39, 1.0 }
 0x909   : > { %1874 = vrcp.f32 %v929_v40 }
 0x913   : > { %v1875_v41 = vpop.eup %1874 }
 0x914   : > { %v931_v42 = vmul.f32 %v1875_v41, %v857_v26 }
 0x916   : > { %v932_v43 = vmul.f32 %v931_v42, %v918_v28 }
 0x918   : > { %934 = vst.msk [vmem:[#allocation2 + $0x9] sm:$0x1] %vm192_vm1, %v932_v43 }
 0x949   : > { %v992_v44 = vpop.f32.mrb[20].mxu0 }
 0x94a   : > { %v1009_v45 = vpack.c.bf16 %v992_v44, %v992_v44  ;;  %v1755_v46 = vpop.f32.mrb[21].mxu0  ;;  %v998_v47 = vand.u32 2147483647, %v992_v44 }
 0x94b   : > { %v995_v48 = vpop.f32.mrb[22].mxu0 }
 0x94c   : > { %v1756_v49 = vpop.f32.mrb[23].mxu0  ;;  %1762 = vmatmul.mubr.msk.bf16.vlgmr.msra.gmra.mrb[20].mxu1 %vm211_vm3, %v1009_v45  ;;  %v999_v50 = vsel %vm192_vm1, %v998_v47, -inf }
 0x94d   : > { %1000 = vmax.xlane.f32.xlu0 %v999_v50  ;;  %1777 = vmatprep.mubr.msk.bf16.mxu1 %vm1913_vm0, %v1912_v1 }
 0x94e   : > { %1774 = vmatpush3.bf16.msra.mxu1 %v1850_v4 }
 0x94f   : > { %1775 = vmatprep.subr.bf16.mxu1 %v1912_v1 }
 0x952   : > { %1776 = vmatpush3.bf16.msra.mxu1 %v1178_v6 }
 0x953   : > { %1789 = vmatprep.subr.bf16.mxu1 %v1912_v1 }
 0x9da   : > { %v1001_v54 = vpop.xlane.xlu0 %1000 }
 0x9db   : > { %v1002_v55 = vmul.f32 %v1001_v54, %v931_v42 }
 0x9dd   : > { %v1003_v56 = vmax.f32 %v1002_v55, 1.0 }
 0x9df   : > { %1876 = vrcp.f32 %v1003_v56 }
 0x9e9   : > { %v1877_v57 = vpop.eup %1876 }
 0x9ea   : > { %v1005_v58 = vmul.f32 %v1877_v57, %v931_v42 }
 0x9ec   : > { %v1006_v59 = vmul.f32 %v1005_v58, %v992_v44 }
 0x9ee   : > { %1008 = vst.msk [vmem:[#allocation2 + $0xa] sm:$0x1] %vm192_vm1, %v1006_v59 }
 0xa1f   : > { %v1066_v60 = vpop.f32.mrb[20].mxu1 }
 0xa20   : > { %v1083_v61 = vpack.c.bf16 %v1066_v60, %v1066_v60  ;;  %v1763_v62 = vpop.f32.mrb[21].mxu1  ;;  %v1072_v63 = vand.u32 2147483647, %v1066_v60 }
 0xa21   : > { %v1069_v0 = vpop.f32.mrb[22].mxu1 }
 0xa22   : > { %v1764_v2 = vpop.f32.mrb[23].mxu1  ;;  %1770 = vmatmul.mubr.msk.bf16.vlgmr.msra.gmra.mrb[24].mxu0 %vm211_vm3, %v1083_v61  ;;  %v1073_v3 = vsel %vm192_vm1, %v1072_v63, -inf }
 0xa23   : > { %1074 = vmax.xlane.f32.xlu1 %v1073_v3  ;;  %1785 = vmatprep.mubr.msk.bf16.mxu0 %vm1913_vm0, %v1912_v1 }
 0xa24   : > { %1782 = vmatpush3.bf16.msra.mxu0 %v1852_v20 }
 0xa25   : > { %1783 = vmatprep.subr.bf16.mxu0 %v1912_v1 }
 0xa28   : > { %1784 = vmatpush3.bf16.msra.mxu0 %v1252_v22 }
 0xab0   : > { %v1075_v7 = vpop.xlane.xlu1 %1074 }
 0xab1   : > { %v1076_v8 = vmul.f32 %v1075_v7, %v1005_v58 }
 0xab3   : > { %v1077_v9 = vmax.f32 %v1076_v8, 1.0 }
 0xab5   : > { %1878 = vrcp.f32 %v1077_v9 }
 0xabf   : > { %v1879_v10 = vpop.eup %1878 }
 0xac0   : > { %v1079_v11 = vmul.f32 %v1879_v10, %v1005_v58 }
 0xac2   : > { %v1080_v12 = vmul.f32 %v1079_v11, %v1066_v60 }
 0xac4   : > { %1082 = vst.msk [vmem:[#allocation2 + $0xb] sm:$0x1] %vm192_vm1, %v1080_v12 }
 0xaf5   : > { %v1140_v13 = vpop.f32.mrb[24].mxu0 }
 0xaf6   : > { %v1157_v14 = vpack.c.bf16 %v1140_v13, %v1140_v13  ;;  %v1771_v15 = vpop.f32.mrb[25].mxu0  ;;  %v1146_v16 = vand.u32 2147483647, %v1140_v13 }
 0xaf7   : > { %v1143_v17 = vpop.f32.mrb[26].mxu0 }
 0xaf8   : > { %v1772_v18 = vpop.f32.mrb[27].mxu0  ;;  %1778 = vmatmul.mubr.msk.bf16.vlgmr.msra.gmra.mrb[24].mxu1 %vm211_vm3, %v1157_v14  ;;  %v1147_v19 = vsel %vm192_vm1, %v1146_v16, -inf }
 0xaf9   : > { %1148 = vmax.xlane.f32.xlu0 %v1147_v19  ;;  %1793 = vmatprep.mubr.msk.bf16.mxu1 %vm1913_vm0, %v1912_v1 }
 0xafa   : > { %1790 = vmatpush3.bf16.msra.mxu1 %v1854_v36 }
 0xafb   : > { %1791 = vmatprep.subr.bf16.mxu1 %v1912_v1 }
 0xafe   : > { %1792 = vmatpush3.bf16.msra.mxu1 %v1326_v38 }
 0xb86   : > { %v1149_v23 = vpop.xlane.xlu0 %1148 }
 0xb87   : > { %v1150_v24 = vmul.f32 %v1149_v23, %v1079_v11 }
 0xb89   : > { %v1151_v25 = vmax.f32 %v1150_v24, 1.0 }
 0xb8b   : > { %1880 = vrcp.f32 %v1151_v25 }
 0xb95   : > { %v1881_v26 = vpop.eup %1880 }
 0xb96   : > { %v1153_v27 = vmul.f32 %v1881_v26, %v1079_v11 }
 0xb98   : > { %v1154_v28 = vmul.f32 %v1153_v27, %v1140_v13 }
 0xb9a   : > { %1156 = vst.msk [vmem:[#allocation2 + $0xc] sm:$0x1] %vm192_vm1, %v1154_v28 }
 0xbcb   : > { %v1214_v29 = vpop.f32.mrb[24].mxu1 }
 0xbcc   : > { %v1231_v30 = vpack.c.bf16 %v1214_v29, %v1214_v29  ;;  %v1779_v31 = vpop.f32.mrb[25].mxu1  ;;  %v1220_v32 = vand.u32 2147483647, %v1214_v29 }
 0xbcd   : > { %v1217_v33 = vpop.f32.mrb[26].mxu1 }
 0xbce   : > { %v1780_v34 = vpop.f32.mrb[27].mxu1  ;;  %1786 = vmatmul.mubr.msk.bf16.vlgmr.msra.gmra.mrb[28].mxu0 %vm211_vm3, %v1231_v30  ;;  %v1221_v35 = vsel %vm192_vm1, %v1220_v32, -inf }
 0xbcf   : > { %1222 = vmax.xlane.f32.xlu1 %v1221_v35 }
 0xc5c   : > { %v1223_v39 = vpop.xlane.xlu1 %1222 }
 0xc5d   : > { %v1224_v40 = vmul.f32 %v1223_v39, %v1153_v27 }
 0xc5f   : > { %v1225_v41 = vmax.f32 %v1224_v40, 1.0 }
 0xc61   : > { %1882 = vrcp.f32 %v1225_v41 }
 0xc6b   : > { %v1883_v42 = vpop.eup %1882 }
 0xc6c   : > { %v1227_v43 = vmul.f32 %v1883_v42, %v1153_v27 }
 0xc6e   : > { %v1228_v44 = vmul.f32 %v1227_v43, %v1214_v29 }
 0xc70   : > { %1230 = vst.msk [vmem:[#allocation2 + $0xd] sm:$0x1] %vm192_vm1, %v1228_v44 }
 0xca1   : > { %v1288_v45 = vpop.f32.mrb[28].mxu0 }
 0xca2   : > { %v1305_v46 = vpack.c.bf16 %v1288_v45, %v1288_v45  ;;  %v1787_v47 = vpop.f32.mrb[29].mxu0  ;;  %v1294_v48 = vand.u32 2147483647, %v1288_v45 }
 0xca3   : > { %v1291_v49 = vpop.f32.mrb[30].mxu0 }
 0xca4   : > { %v1788_v50 = vpop.f32.mrb[31].mxu0  ;;  %1794 = vmatmul.mubr.msk.bf16.vlgmr.msra.gmra.mrb[28].mxu1 %vm211_vm3, %v1305_v46  ;;  %v1295_v1 = vsel %vm192_vm1, %v1294_v48, -inf }
 0xca5   : > { %1296 = vmax.xlane.f32.xlu0 %v1295_v1 }
 0xd32   : > { %v1297_v51 = vpop.xlane.xlu0 %1296 }
 0xd33   : > { %v1298_v52 = vmul.f32 %v1297_v51, %v1227_v43 }
 0xd35   : > { %v1299_v53 = vmax.f32 %v1298_v52, 1.0 }
 0xd37   : > { %1884 = vrcp.f32 %v1299_v53 }
 0xd41   : > { %v1885_v54 = vpop.eup %1884 }
 0xd42   : > { %v1301_v55 = vmul.f32 %v1885_v54, %v1227_v43 }
 0xd44   : > { %v1302_v56 = vmul.f32 %v1301_v55, %v1288_v45 }
 0xd46   : > { %1304 = vst.msk [vmem:[#allocation2 + $0xe] sm:$0x1] %vm192_vm1, %v1302_v56 }
 0xd77   : > { %v1362_v57 = vpop.f32.mrb[28].mxu1 }
 0xd78   : > { %v1368_v58 = vand.u32 2147483647, %v1362_v57  ;;  %v1795_v59 = vpop.f32.mrb[29].mxu1 }
 0xd79   : > { %v1365_v60 = vpop.f32.mrb[30].mxu1 }
 0xd7a   : > { %v1796_v61 = vpop.f32.mrb[31].mxu1  ;;  %v1369_v62 = vsel %vm192_vm1, %v1368_v58, -inf }
 0xd7b   : > { %1370 = vmax.xlane.f32.xlu1 %v1369_v62 }
 0xe08   : > { %v1371_v63 = vpop.xlane.xlu1 %1370 }
 0xe09   : > { %v1372_v0 = vmul.f32 %v1371_v63, %v1301_v55 }
 0xe0b   : > { %v1373_v2 = vmax.f32 %v1372_v0, 1.0 }
 0xe0d   : > { %1886 = vrcp.f32 %v1373_v2 }
 0xe17   : > { %v1887_v3 = vpop.eup %1886 }
 0xe18   : > { %v1375_v4 = vmul.f32 %v1887_v3, %v1301_v55 }
 0xe1a   : > { %v1376_v5 = vmul.f32 %v1375_v4, %v1362_v57 }
 0xe1c   : > { %1378 = vst.msk [vmem:[#allocation2 + $0xf] sm:$0x1] %vm192_vm1, %v1376_v5  ;;  %1379 = vst.msk [vmem:[#allocation3] sm:$0x1] %vm192_vm1, %v1376_v5 }
 0xe23   : > { %v1381_v6 = vld [vmem:[#allocation2 + $0x8] sm:$0xff] }
 0xe24   : > { %v1620_v7 = vpack.c.bf16 %v1381_v6, %v1381_v6 }
 0xe26   : > { %1392 = vst.msk [vmem:[%s2062_s22 + $0x4] sm:$0xf] %vm1390_vm4, %v1620_v7 }
 0xe27 PF: > { %s12_s11 = sadd.s32 1, %s1910_s11   ;;  %s2142_s9 = smov %s1906_s10 }
 0xe28   : > { %p9_p5 = scmp.ge.s32.totalorder %s12_s11, 4   ;;  %s2143_s10 = smov %s2145_s12 }
 0xe2a   :  { %11 = sbr.rel (!%p9_p5) target bundleno = 2 (0x2), region = 93 }

</bundles_post_ra>
